<compile_context>
chip_gen: v7x
topology: tpu7x:2x2x1
jax: 0.10.0
libtpu: 0.0.40
codegen_flags: <defaults>
</compile_context>

<pallas_src>
import jax
import jax.numpy as jnp
from jax.experimental import pallas as pl
from jax.experimental.pallas import tpu as pltpu

_WIDTH = 1024  # 8 * 128: lane-dense, (8,128)-aligned slab width.


def _sigmoid_kernel(x_ref, o_ref):
    x = x_ref[...]
    # Upcast in-register only when the input is narrower than f32; never
    # pre-cast in the wrapper (that would double HBM bytes for bf16 inputs).
    if x.dtype != jnp.float32:
        x = x.astype(jnp.float32)
    # Exact sigmoid: 1 / (1 + exp(-x)).  exp -> EUP, add/div -> VPU.
    y = 1.0 / (1.0 + jnp.exp(-x))
    o_ref[...] = y.astype(o_ref.dtype)


def _round_up(a: int, b: int) -> int:
    return ((a + b - 1) // b) * b


def _default_block_bytes() -> int:
    """4 MiB blocks on v7x (64 MiB VMEM/TC), 8 MiB on v5e/v6e (128 MiB)."""
    try:
        info = pltpu.get_tpu_info()
        vmem = int(getattr(info, "vmem_capacity_bytes", 64 << 20))
    except Exception:
        vmem = 64 << 20  # conservative default (v7x-sized)
    return (8 << 20) if vmem >= (100 << 20) else (4 << 20)


def sigmoid_pallas(x: jax.Array, *, target_block_bytes: int | None = None) -> jax.Array:
    """Elementwise sigmoid 1/(1+exp(-x)); matches torch semantics exactly."""
    orig_shape = x.shape
    dtype = x.dtype
    n = x.size
    if n == 0:
        return x

    if target_block_bytes is None:
        target_block_bytes = _default_block_bytes()

    # Tiny arrays (< one slab row): single whole-array block, no tiling.
    if n < _WIDTH:
        out = pl.pallas_call(
            _sigmoid_kernel,
            out_shape=jax.ShapeDtypeStruct((1, n), dtype),
        )(jnp.reshape(x, (1, n)))
        return jnp.reshape(out, orig_shape)

    # Contiguous flatten is layout-free; no padding anywhere.
    x_flat = jnp.reshape(x, (-1,))
    n_main = (n // _WIDTH) * _WIDTH
    rows = n_main // _WIDTH
    x_main = x_flat if n_main == n else jax.lax.slice(x_flat, (0,), (n_main,))
    x2d = jnp.reshape(x_main, (rows, _WIDTH))

    # Byte-sized blocks: keep ~target_block_bytes per step regardless of dtype.
    itemsize = jnp.dtype(dtype).itemsize
    tile_rows = max(8, target_block_bytes // (_WIDTH * itemsize))
    if rows <= 8:
        block_rows = rows  # full-extent block (no (8,128) constraint needed)
    else:
        # At least 2 grid steps so v7x's second TensorCore gets work.
        half = _round_up(pl.cdiv(rows, 2), 8)
        block_rows = min(tile_rows, half)
    grid = (pl.cdiv(rows, block_rows),)

    block_bytes = block_rows * _WIDTH * itemsize
    # (in + out) * double-buffering = 4x block bytes resident; 2x headroom.
    vmem_limit = int(max(32 << 20, 8 * block_bytes))

    out2d = pl.pallas_call(
        _sigmoid_kernel,
        out_shape=jax.ShapeDtypeStruct((rows, _WIDTH), dtype),
        grid_spec=pltpu.PrefetchScalarGridSpec(
            num_scalar_prefetch=0,
            grid=grid,
            in_specs=[pl.BlockSpec((block_rows, _WIDTH), lambda i: (i, 0))],
            out_specs=pl.BlockSpec((block_rows, _WIDTH), lambda i: (i, 0)),
        ),
        compiler_params=pltpu.CompilerParams(
            dimension_semantics=("parallel",),
            vmem_limit_bytes=vmem_limit,
        ),
    )(x2d)

    out_main = jnp.reshape(out2d, (n_main,))
    if n_main == n:
        return jnp.reshape(out_main, orig_shape)

    # Ragged tail (< 1024 elements): plain jnp, negligible cost, avoids any
    # full-array pad/slice pass.
    tail = jax.lax.slice(x_flat, (n_main,), (n,)).astype(jnp.float32)
    tail_out = (1.0 / (1.0 + jnp.exp(-tail))).astype(dtype)
    out_flat = jnp.concatenate([out_main, tail_out])
    return jnp.reshape(out_flat, orig_shape)


if __name__ == "__main__":
    key = jax.random.PRNGKey(0)
    k0, k1, k2 = jax.random.split(key, 3)

    def _ref(v):
        return 1.0 / (1.0 + jnp.exp(-v))

    # Primary case: small NCHW-style activation (aligned: 2048 elements).
    x = jax.random.normal(k0, (2, 4, 16, 16), dtype=jnp.float32)
    out = jax.block_until_ready(sigmoid_pallas(x))
    assert out.shape == x.shape and out.dtype == x.dtype
    assert jnp.allclose(out, _ref(x), atol=1e-6, rtol=1e-6)

    # Unaligned size (exercises kernel prefix + jnp tail path).
    x_u = jax.random.normal(k1, (5, 401), dtype=jnp.float32)  # 2005 elems
    out_u = jax.block_until_ready(sigmoid_pallas(x_u))
    assert out_u.shape == x_u.shape and out_u.dtype == x_u.dtype
    assert jnp.allclose(out_u, _ref(x_u), atol=1e-6, rtol=1e-6)

    # Tiny array (exercises single whole-block path).
    x_t = jax.random.normal(k2, (3, 7, 11), dtype=jnp.float32)  # 231 elems
    out_t = jax.block_until_ready(sigmoid_pallas(x_t))
    assert out_t.shape == x_t.shape and out_t.dtype == x_t.dtype
    assert jnp.allclose(out_t, _ref(x_t), atol=1e-6, rtol=1e-6)

    print("KERNEL_OK")
</pallas_src>

<mosaic_0001>
module attributes {stable_mosaic.version = 11 : i64} {
  func.func @_sigmoid_kernel(%arg0: i32, %arg1: memref<2x1024xf32, #tpu.memory_space<vmem>>, %arg2: memref<2x1024xf32, #tpu.memory_space<vmem>>) attributes {dimension_semantics = [#tpu.dimension_semantics<parallel>], iteration_bounds = array<i64: 1>, scalar_prefetch = 0 : i64, scratch_operands = 0 : i64, tpu.core_type = #tpu.core_type<tc>, window_params = [{transform_indices = @transform_0, window_bounds = array<i64: 2, 1024>}, {transform_indices = @transform_1, window_bounds = array<i64: 2, 1024>}]} {
    %c0 = arith.constant 0 : index
    %c0_0 = arith.constant 0 : index
    %0 = vector.load %arg1[%c0, %c0_0] : memref<2x1024xf32, #tpu.memory_space<vmem>>, vector<2x1024xf32>
    %cst = arith.constant 0.000000e+00 : f32
    %1 = vector.broadcast %cst : f32 to vector<2x1024xf32>
    %2 = arith.subf %1, %0 : vector<2x1024xf32>
    %3 = math.exp %2 : vector<2x1024xf32>
    %cst_1 = arith.constant 1.000000e+00 : f32
    %4 = vector.broadcast %cst_1 : f32 to vector<2x1024xf32>
    %5 = arith.addf %4, %3 : vector<2x1024xf32>
    %cst_2 = arith.constant 1.000000e+00 : f32
    %6 = vector.broadcast %cst_2 : f32 to vector<2x1024xf32>
    %7 = arith.divf %6, %5 : vector<2x1024xf32>
    %c0_3 = arith.constant 0 : index
    %c0_4 = arith.constant 0 : index
    %8 = vector.load %arg2[%c0_3, %c0_4] : memref<2x1024xf32, #tpu.memory_space<vmem>>, vector<2x1024xf32>
    tpu.vector_store %arg2[%c0_3, %c0_4], %7 {strides = array<i32>} : memref<2x1024xf32, #tpu.memory_space<vmem>>, vector<2x1024xf32>,
    return
  }
  func.func @transform_0(%arg0: i32) -> (i32, i32) {
    %c0_i32 = arith.constant 0 : i32
    %c0_i32_0 = arith.constant 0 : i32
    return %arg0, %c0_i32 : i32, i32
  }
  func.func @transform_1(%arg0: i32) -> (i32, i32) {
    %c0_i32 = arith.constant 0 : i32
    %c0_i32_0 = arith.constant 0 : i32
    return %arg0, %c0_i32 : i32, i32
  }
}

</mosaic_0001>

<bundles_post_ra>
// kernel: tpu_custom_call.1
= control target key start
LH: loop header
LB: loop body
LE: loop exit
PB: predicated region body
PF: predicated region fallthrough
CT: control target
= control target key end

     0   :  { %6 = vsyncpa [#allocation3], 0  ;;  %s146_s0 = inlined_call_operand.hbm [shape: f32[2,1024], index: 0, kind: input, shape index: {}]   ;;  %s147_s1 = inlined_call_operand.hbm [shape: f32[2,1024], index: 1, kind: output, shape index: {}]  }
   0x1   :  { %7 = vsyncpa [#allocation4], 0  ;;  %s110_s6 = smov [#allocation2]   ;;  %s62_s10 = scalar_lea.hbm %s146_s0, 256 }
   0x2   :  { %s14_s7 = sshll.u32 %s110_s6, 4  ;;  %p63_p0 = scmp.ne.s32.totalorder %s146_s0, %s62_s10  ;;  %s15_s7 = int_to_ptr.vmem [resolvable:$true] %s14_s7 }
   0x3   :  { %p66_p1 = scmp.lt.u32.totalorder %s62_s10, %s146_s0 }
   0x5   :  { %p68_p2 = pnand %p66_p1, %p63_p0 }
   0x7   :  { %71 = shalt.err (!%p68_p2)
}
   0x8   :  { %s72_s15 = scalar_lea.vmem %s15_s7, 256  ;;  %p77_p4 = scmp.lt.s32.totalorder %s15_s7, %s15_s7 }
   0x9   :  { %p73_p3 = scmp.ne.s32.totalorder %s15_s7, %s72_s15  ;;  %p78_p5 = scmp.lt.s32.totalorder %s72_s15, %s72_s15 }
   0xb   :  { %p79_p6 = por %p78_p5, %p77_p4 }
   0xd   :  { %p80_p7 = pnand %p79_p6, %p73_p3 }
   0xf   :  { %83 = shalt.err (!%p80_p7)
}
  0x10   :  { %17 = dma.hbm_to_vmem [thread:$0]  %s146_s0, 256, %s15_s7, [#allocation3]  }
  0x11   :  { %106 = dma.done.wait [#allocation3], 256  }
  0x12   :  { %107 = vsyncadd [#allocation3], 4294967040  ;;  %v21_v0 = vld [vmem:[#allocation2] sm:$0xff]  ;;  %v22_v1 = vld [vmem:[#allocation2 + $0x8] sm:$0xff]  ;;  %s111_s18 = smov [#allocation5]  }
  0x13   :  { %v23_v2 = vsub.f32 0.0, %v21_v0  ;;  %v24_v3 = vsub.f32 0.0, %v22_v1  ;;  %s43_s19 = sshll.u32 %s111_s18, 4  ;;  %s44_s19 = int_to_ptr.vmem [resolvable:$true] %s43_s19 }
  0x14   :  { %s84_s0 = scalar_lea.vmem %s44_s19, 256  ;;  %p89_p9 = scmp.lt.s32.totalorder %s44_s19, %s44_s19 }
  0x15   :  { %v25_v4 = vmul.f32 1.442695, %v23_v2  ;;  %v27_v5 = vmul.f32 1.442695, %v24_v3  ;;  %p85_p8 = scmp.ne.s32.totalorder %s44_s19, %s84_s0  ;;  %p90_p10 = scmp.lt.s32.totalorder %s84_s0, %s84_s0 }
  0x17   :  { %54 = vpow2.f32 %v25_v4  ;;  %p91_p11 = por %p90_p10, %p89_p9 }
  0x18   :  { %56 = vpow2.f32 %v27_v5 }
  0x19   :  { %p92_p12 = pnand %p91_p11, %p85_p8 }
  0x21   :  { %v55_v6 = vpop.eup %54 }
  0x22   :  { %v57_v7 = vpop.eup %56  ;;  %v29_v8 = vadd.f32 1.0, %v55_v6 }
  0x23   :  { %v30_v9 = vadd.f32 1.0, %v57_v7 }
  0x24   :  { %58 = vrcp.f32 %v29_v8 }
  0x25   :  { %60 = vrcp.f32 %v30_v9 }
  0x2e   :  { %v59_v10 = vpop.eup %58 }
  0x2f   :  { %v61_v11 = vpop.eup %60  ;;  %35 = vst [vmem:[#allocation5] sm:$0xff] %v59_v10 }
  0x30   :  { %36 = vst [vmem:[#allocation5 + $0x8] sm:$0xff] %v61_v11 }
  0x31   :  { %95 = shalt.err (!%p92_p12)
}
  0x32   :  { %s96_s22 = scalar_lea.hbm %s147_s1, 256 }
  0x33   :  { %p97_p13 = scmp.ne.s32.totalorder %s147_s1, %s96_s22  ;;  %p100_p0 = scmp.lt.u32.totalorder %s96_s22, %s147_s1 }
  0x35   :  { %p102_p1 = pnand %p100_p0, %p97_p13 }
  0x37   :  { %105 = shalt.err (!%p102_p1)
}
  0x38   :  { %46 = dma.vmem_to_hbm [thread:$0]  %s44_s19, 256, %s147_s1, [#allocation4]  }
  0x39   :  { %108 = dma.done.wait [#allocation4], 256  }
  0x3a   :  { %109 = vsyncadd [#allocation4], 4294967040 }
  0x3b   :  { %50 = vsyncpa [#allocation3], 1 }
  0x3c   :  { %51 = vsyncpa [#allocation4], 1 }

</bundles_post_ra>
